<compile_context>
chip_gen: v6e
topology: v6e:2x2x1
jax: 0.10.0
libtpu: 0.0.40
codegen_flags: <defaults>
</compile_context>

<pallas_src>
import functools

import jax
import jax.numpy as jnp
from jax.experimental import pallas as pl
from jax.experimental.pallas import tpu as pltpu

BN_EPS = 1e-5


def _round_up(x, m):
    return (x + m - 1) // m * m


# ----------------------------- Pallas kernels ------------------------------

def _gemm_bias_relu_kernel(a_ref, b_ref, c_ref, o_ref):
    """(tm, K) x (K, cout) MXU GEMM with fused bias (BN scale pre-folded into B) + ReLU."""
    y = jnp.dot(a_ref[...], b_ref[...], preferred_element_type=jnp.float32) + c_ref[...]
    o_ref[...] = jnp.maximum(y, 0.0).astype(o_ref.dtype)


def _bottleneck_kernel(*refs, width, has_sel, has_ds):
    """Whole ResNet bottleneck in a single kernel; every intermediate stays in VMEM.

    conv1 (1x1) -> scratch -> conv2 (3x3: 9 shifted-view MXU dots + boundary masks)
    [-> stride-2 row-selection matmul] -> conv3 (1x1) -> + identity/downsample -> ReLU.
    BN scales are pre-folded into the weight matrices; epilogues are bias adds only.
    """
    it = iter(refs)
    x_ref = next(it)                            # (m_in, cin)             bf16
    w1_ref = next(it)                           # (cin, planes)           bf16
    b1_ref = next(it)                           # (1, planes)             f32
    w2_ref = next(it)                           # (9, planes, planes)     bf16
    b2_ref = next(it)                           # (1, planes)             f32
    mk_ref = next(it)                           # (9, m_in, 1)            bf16 0/1 masks
    w3_ref = next(it)                           # (planes, cout)          bf16
    b3_ref = next(it)                           # (1, cout)               f32
    sel_ref = next(it) if has_sel else None     # (m_out, m_in)           bf16 selection
    wd_ref = next(it) if has_ds else None       # (cin, cout)             bf16
    bd_ref = next(it) if has_ds else None       # (1, cout)               f32
    o_ref = next(it)                            # (m_out, cout)           bf16
    y1s_ref = next(it)                          # (m_in + 2*(width+1), planes) bf16 scratch

    m_in = x_ref.shape[0]
    base = width + 1
    planes = w1_ref.shape[1]
    x = x_ref[...]

    # conv1 (1x1) + bias + ReLU
    y1 = jnp.dot(x, w1_ref[...], preferred_element_type=jnp.float32) + b1_ref[...]
    y1 = jnp.maximum(y1, 0.0).astype(jnp.bfloat16)

    # stage conv1 output in a shift-friendly scratch (zeroed halo rows)
    y1s_ref[...] = jnp.zeros_like(y1s_ref)
    y1s_ref[pl.ds(base, m_in), :] = y1

    # conv2 (3x3, pad 1) at full resolution: 9 accumulating MXU dots over shifted scratch views
    acc = jnp.zeros((m_in, planes), jnp.float32)
    for dy in (-1, 0, 1):
        for dx in (-1, 0, 1):
            t = (dy + 1) * 3 + (dx + 1)
            off = dy * width + dx
            shifted = y1s_ref[pl.ds(base + off, m_in), :]
            tap = shifted * mk_ref[t]           # zero out taps that fall outside the image
            acc = acc + jnp.dot(tap, w2_ref[t], preferred_element_type=jnp.float32)
    y2 = jnp.maximum(acc + b2_ref[...], 0.0).astype(jnp.bfloat16)

    # stride-2 blocks: subsample conv2 rows (and the identity path) with a 0/1 selection matmul
    if has_sel:
        sel = sel_ref[...]
        y2 = jnp.dot(sel, y2, preferred_element_type=jnp.float32).astype(jnp.bfloat16)
        xi = jnp.dot(sel, x, preferred_element_type=jnp.float32).astype(jnp.bfloat16)
    else:
        xi = x

    # conv3 (1x1) + bias
    y3 = jnp.dot(y2, w3_ref[...], preferred_element_type=jnp.float32) + b3_ref[...]

    # identity / downsample, residual add, final ReLU (all fused)
    if has_ds:
        ident = jnp.dot(xi, wd_ref[...], preferred_element_type=jnp.float32) + bd_ref[...]
    else:
        ident = xi.astype(jnp.float32)
    o_ref[...] = jnp.maximum(y3 + ident, 0.0).astype(o_ref.dtype)


# ------------------------------ JAX glue -----------------------------------

def _full_spec(arr):
    nd = arr.ndim
    return pl.BlockSpec(arr.shape, lambda i, _nd=nd: (0,) * _nd)


def _tap_masks(n, h, w):
    """(9, n*h*w, 1) bf16 0/1 masks: does output pixel p have a valid (dy, dx) neighbor?"""
    oi = jnp.arange(h).reshape(1, h, 1)
    oj = jnp.arange(w).reshape(1, 1, w)
    ms = []
    for dy in (-1, 0, 1):
        for dx in (-1, 0, 1):
            v = (oi + dy >= 0) & (oi + dy < h) & (oj + dx >= 0) & (oj + dx < w)
            ms.append(jnp.broadcast_to(v, (n, h, w)).reshape(n * h * w, 1))
    return jnp.stack(ms, axis=0).astype(jnp.bfloat16)


def _sel_matrix(n, h, w, stride):
    """0/1 matrix selecting full-resolution rows that survive a stride-s spatial subsampling."""
    oh = (h - 1) // stride + 1
    ow = (w - 1) // stride + 1
    b = jnp.arange(n).reshape(n, 1, 1)
    oi = jnp.arange(oh).reshape(1, oh, 1)
    oj = jnp.arange(ow).reshape(1, 1, ow)
    src = (b * (h * w) + (oi * stride) * w + (oj * stride)).reshape(-1)
    return jax.nn.one_hot(src, n * h * w, dtype=jnp.bfloat16), oh, ow


def fused_bottleneck(x, bp):
    """x: (n, h, w, cin) bf16 NHWC.  Whole bottleneck in one pallas_call."""
    n, h, w, cin = x.shape
    stride = bp["stride"]
    w1, b1 = bp["conv1"]
    w2, b2 = bp["conv2"]
    w3, b3 = bp["conv3"]
    planes = w1.shape[1]
    cout = w3.shape[1]
    m_in = n * h * w

    operands = [x.reshape(m_in, cin), w1, b1, w2, b2, _tap_masks(n, h, w), w3, b3]
    has_sel = stride != 1
    if has_sel:
        sel, oh, ow = _sel_matrix(n, h, w, stride)
        operands.append(sel)
    else:
        oh, ow = h, w
    m_out = n * oh * ow
    has_ds = bp["downsample"] is not None
    if has_ds:
        wd, bd = bp["downsample"]
        operands += [wd, bd]

    kernel = functools.partial(_bottleneck_kernel, width=w,
                               has_sel=has_sel, has_ds=has_ds)
    out = pl.pallas_call(
        kernel,
        out_shape=jax.ShapeDtypeStruct((m_out, cout), jnp.bfloat16),
        grid_spec=pltpu.PrefetchScalarGridSpec(
            num_scalar_prefetch=0,
            grid=(1,),
            in_specs=[_full_spec(op) for op in operands],
            out_specs=pl.BlockSpec((m_out, cout), lambda i: (0, 0)),
            scratch_shapes=[pltpu.VMEM((m_in + 2 * (w + 1), planes), jnp.bfloat16)],
        ),
        compiler_params=pltpu.CompilerParams(dimension_semantics=("arbitrary",)),
    )(*operands)
    return out.reshape(n, oh, ow, cout)


def _patches(x, kh, kw, stride, pad):
    """im2col patches, (n*oh*ow, K), via the XLA-fused patches primitive (stem conv only)."""
    n = x.shape[0]
    p = jax.lax.conv_general_dilated_patches(
        x, (kh, kw), (stride, stride), [(pad, pad), (pad, pad)],
        dimension_numbers=("NHWC", "HWIO", "NHWC"))
    oh, ow, k = p.shape[1], p.shape[2], p.shape[3]
    return p.reshape(n * oh * ow, k), oh, ow


def _weight_matrix(w):
    """Flatten (kh, kw, cin, cout) -> (K, cout) in exactly the K-ordering of _patches, by
    running the same patches primitive on the kernel itself (batch = cout)."""
    kh, kw, cin, cout = w.shape
    w_img = jnp.transpose(w, (3, 0, 1, 2))
    cols = jax.lax.conv_general_dilated_patches(
        w_img, (kh, kw), (1, 1), [(0, 0), (0, 0)],
        dimension_numbers=("NHWC", "HWIO", "NHWC"))
    return cols.reshape(cout, kh * kw * cin).T


def stem_conv(x, prep):
    """7x7/s2/p3 conv + folded BN + ReLU as a bf16 im2col GEMM.  x: NHWC bf16."""
    wmat, bias = prep
    n = x.shape[0]
    patches, oh, ow = _patches(x, 7, 7, 2, 3)
    patches = patches.astype(jnp.bfloat16)
    m, K = patches.shape
    cout = wmat.shape[1]
    tm = min(128, _round_up(m, 16))          # 16-row multiples: bf16 sublane packing
    mp = _round_up(m, tm)
    if mp != m:
        patches = jnp.pad(patches, ((0, mp - m), (0, 0)))
    out = pl.pallas_call(
        _gemm_bias_relu_kernel,
        out_shape=jax.ShapeDtypeStruct((mp, cout), jnp.bfloat16),
        grid_spec=pltpu.PrefetchScalarGridSpec(
            num_scalar_prefetch=0,
            grid=(mp // tm,),
            in_specs=[pl.BlockSpec((tm, K), lambda i: (i, 0)),
                      pl.BlockSpec((K, cout), lambda i: (0, 0)),
                      pl.BlockSpec((1, cout), lambda i: (0, 0))],
            out_specs=pl.BlockSpec((tm, cout), lambda i: (i, 0)),
        ),
        compiler_params=pltpu.CompilerParams(dimension_semantics=("parallel",)),
    )(patches, wmat, bias)
    if mp != m:
        out = out[:m]
    return out.reshape(n, oh, ow, cout)


def maxpool_3x3_s2(x):
    """MaxPool 3x3/s2/p1 as a running maximum over 9 shifted strided views (XLA fuses it)."""
    n, h, w, c = x.shape
    k, s, pad = 3, 2, 1
    oh = (h + 2 * pad - k) // s + 1
    ow = (w + 2 * pad - k) // s + 1
    xp = jnp.pad(x, ((0, 0), (pad, pad), (pad, pad), (0, 0)),
                 constant_values=-jnp.inf)
    out = None
    for i in range(k):
        for j in range(k):
            v = xp[:, i:i + oh * s:s, j:j + ow * s:s, :]
            out = v if out is None else jnp.maximum(out, v)
    return out


# ---------------------- deterministic synthetic parameters -----------------

def _conv_bn_params(key, kh, kw, cin, cout):
    k1, k2, k3, k4, k5 = jax.random.split(key, 5)
    fan_in = kh * kw * cin
    w = jax.random.normal(k1, (kh, kw, cin, cout), jnp.float32) * jnp.sqrt(2.0 / fan_in)
    gamma = 1.0 + 0.1 * jax.random.normal(k2, (cout,), jnp.float32)
    beta = 0.1 * jax.random.normal(k3, (cout,), jnp.float32)
    rmean = 0.1 * jax.random.normal(k4, (cout,), jnp.float32)
    rvar = 1.0 + 0.1 * jnp.abs(jax.random.normal(k5, (cout,), jnp.float32))
    scale = gamma / jnp.sqrt(rvar + BN_EPS)       # eval-mode BN folded into scale/bias
    bias = beta - rmean * scale
    return (w, scale, bias)


def make_params(key):
    keys = iter(jax.random.split(key, 64))
    params = {"conv1": _conv_bn_params(next(keys), 7, 7, 3, 64)}

    def make_layer(inplanes, planes, blocks, stride):
        layer = []
        inp = inplanes
        for b in range(blocks):
            s = stride if b == 0 else 1
            blk = {
                "stride": s,
                "conv1": _conv_bn_params(next(keys), 1, 1, inp, planes),
                "conv2": _conv_bn_params(next(keys), 3, 3, planes, planes),
                "conv3": _conv_bn_params(next(keys), 1, 1, planes, planes * 4),
                "downsample": (_conv_bn_params(next(keys), 1, 1, inp, planes * 4)
                               if (s != 1 or inp != planes * 4) else None),
            }
            inp = planes * 4
            layer.append(blk)
        return layer

    params["layer1"] = make_layer(64, 64, 3, 1)      # res2 -> 256 ch
    params["layer2"] = make_layer(256, 128, 4, 2)    # res3 -> 512 ch, /2
    params["layer3"] = make_layer(512, 256, 6, 2)    # res4 -> 1024 ch, /2
    return params


def _prep_1x1(w, scale, bias):
    wm = (w.reshape(w.shape[2], w.shape[3]) * scale[None, :]).astype(jnp.bfloat16)
    return wm, bias.reshape(1, -1).astype(jnp.float32)


def _prep_3x3(w, scale, bias):
    wm = (w * scale[None, None, None, :]).reshape(9, w.shape[2], w.shape[3]).astype(jnp.bfloat16)
    return wm, bias.reshape(1, -1).astype(jnp.float32)


def _prep_stem(w, scale, bias):
    wm = (_weight_matrix(w) * scale[None, :]).astype(jnp.bfloat16)
    return wm, bias.reshape(1, -1).astype(jnp.float32)


def prepare_params(raw):
    """Fold BN scale into the GEMM weight matrices, cast to bf16, pack biases (done once)."""
    prep = {"conv1": _prep_stem(*raw["conv1"])}
    for lname in ("layer1", "layer2", "layer3"):
        blocks = []
        for b in raw[lname]:
            blocks.append({
                "stride": b["stride"],
                "conv1": _prep_1x1(*b["conv1"]),
                "conv2": _prep_3x3(*b["conv2"]),
                "conv3": _prep_1x1(*b["conv3"]),
                "downsample": (_prep_1x1(*b["downsample"])
                               if b["downsample"] is not None else None),
            })
        prep[lname] = blocks
    return prep


# ----------------------------- forward pass --------------------------------

def encoder_q(in_f, prep):
    """in_f: NCHW float32, same convention as the PyTorch module."""
    x = jnp.transpose(in_f, (0, 2, 3, 1)).astype(jnp.bfloat16)          # -> NHWC bf16
    c1 = stem_conv(x, prep["conv1"])                                    # relu(bn1(conv1(f)))
    x = maxpool_3x3_s2(c1)
    r2 = x
    for bp in prep["layer1"]:
        r2 = fused_bottleneck(r2, bp)
    r3 = r2
    for bp in prep["layer2"]:
        r3 = fused_bottleneck(r3, bp)
    r4 = r3
    for bp in prep["layer3"]:
        r4 = fused_bottleneck(r4, bp)
    nchw32 = lambda t: jnp.transpose(t.astype(jnp.float32), (0, 3, 1, 2))
    return nchw32(r4), nchw32(r3), nchw32(r2), nchw32(c1)


# ------------------------- reference (for self-check) ----------------------

def _conv_bn_ref(x, w, scale, bias, *, stride, pad, relu):
    y = jax.lax.conv_general_dilated(
        x, w, (stride, stride), [(pad, pad), (pad, pad)],
        dimension_numbers=("NHWC", "HWIO", "NHWC"),
        precision=jax.lax.Precision.HIGHEST)
    y = y * scale.reshape(1, 1, 1, -1) + bias.reshape(1, 1, 1, -1)
    if relu:
        y = jnp.maximum(y, 0.0)
    return y


def _bottleneck_ref(x, bp):
    out = _conv_bn_ref(x, *bp["conv1"], stride=1, pad=0, relu=True)
    out = _conv_bn_ref(out, *bp["conv2"], stride=bp["stride"], pad=1, relu=True)
    if bp["downsample"] is not None:
        idn = _conv_bn_ref(x, *bp["downsample"], stride=bp["stride"], pad=0, relu=False)
    else:
        idn = x
    out = _conv_bn_ref(out, *bp["conv3"], stride=1, pad=0, relu=False)
    return jnp.maximum(out + idn, 0.0)


def _rel_err(a, b):
    return float(jnp.linalg.norm((a - b).ravel()) / (jnp.linalg.norm(b.ravel()) + 1e-6))


# --------------------------------- main -------------------------------------

if __name__ == "__main__":
    key = jax.random.PRNGKey(0)
    pkey, xkey = jax.random.split(key)
    raw = make_params(pkey)
    prep = prepare_params(raw)

    # small spatial size (ResNet-50 channel widths are architectural and kept exact)
    x = jax.random.normal(xkey, (2, 3, 32, 32), jnp.float32)

    # --- stem conv correctness vs XLA's conv (bf16 path, loose tolerance) ---
    x_nhwc = jnp.transpose(x, (0, 2, 3, 1))
    got = stem_conv(x_nhwc.astype(jnp.bfloat16), prep["conv1"]).astype(jnp.float32)
    ref = _conv_bn_ref(x_nhwc, *raw["conv1"], stride=2, pad=3, relu=True)
    assert _rel_err(got, ref) < 4e-2, _rel_err(got, ref)

    # --- fused bottleneck correctness: stride-1 (with downsample) and stride-2 blocks ---
    xb = jax.random.normal(jax.random.PRNGKey(1), (2, 8, 8, 64), jnp.float32)
    got_b = fused_bottleneck(xb.astype(jnp.bfloat16), prep["layer1"][0]).astype(jnp.float32)
    ref_b = _bottleneck_ref(xb, raw["layer1"][0])
    assert _rel_err(got_b, ref_b) < 5e-2, _rel_err(got_b, ref_b)

    xb2 = jax.random.normal(jax.random.PRNGKey(2), (2, 8, 8, 256), jnp.float32)
    got_b2 = fused_bottleneck(xb2.astype(jnp.bfloat16), prep["layer2"][0]).astype(jnp.float32)
    ref_b2 = _bottleneck_ref(xb2, raw["layer2"][0])
    assert _rel_err(got_b2, ref_b2) < 5e-2, _rel_err(got_b2, ref_b2)

    # --- full forward ---
    fwd = jax.jit(lambda inp: encoder_q(inp, prep))
    r4, r3, r2, c1 = fwd(x)
    jax.block_until_ready((r4, r3, r2, c1))

    assert c1.shape == (2, 64, 16, 16), c1.shape
    assert r2.shape == (2, 256, 8, 8), r2.shape
    assert r3.shape == (2, 512, 4, 4), r3.shape
    assert r4.shape == (2, 1024, 2, 2), r4.shape
    for t in (r4, r3, r2, c1):
        assert bool(jnp.all(jnp.isfinite(t)))

    print("KERNEL_OK")
</pallas_src>

<mosaic_0001>
module attributes {stable_mosaic.version = 11 : i64} {
  func.func @_gemm_bias_relu_kernel(%arg0: i32, %arg1: memref<128x147xbf16, #tpu.memory_space<vmem>>, %arg2: memref<147x64xbf16, #tpu.memory_space<vmem>>, %arg3: memref<1x64xf32, #tpu.memory_space<vmem>>, %arg4: memref<128x64xbf16, #tpu.memory_space<vmem>>) attributes {dimension_semantics = [#tpu.dimension_semantics<parallel>], iteration_bounds = array<i64: 4>, scalar_prefetch = 0 : i64, scratch_operands = 0 : i64, tpu.core_type = #tpu.core_type<tc>, window_params = [{transform_indices = @transform_0, window_bounds = array<i64: 128, 147>}, {pipeline_mode = #tpu.pipeline_mode<synchronous>, transform_indices = @transform_1, window_bounds = array<i64: 147, 64>}, {pipeline_mode = #tpu.pipeline_mode<synchronous>, transform_indices = @transform_2, window_bounds = array<i64: 1, 64>}, {transform_indices = @transform_3, window_bounds = array<i64: 128, 64>}]} {
    %c0 = arith.constant 0 : index
    %c0_0 = arith.constant 0 : index
    %0 = vector.load %arg1[%c0, %c0_0] : memref<128x147xbf16, #tpu.memory_space<vmem>>, vector<128x147xbf16>
    %c0_1 = arith.constant 0 : index
    %c0_2 = arith.constant 0 : index
    %1 = vector.load %arg2[%c0_1, %c0_2] : memref<147x64xbf16, #tpu.memory_space<vmem>>, vector<147x64xbf16>
    %cst = arith.constant dense<0.000000e+00> : vector<128x64xf32>
    %2 = tpu.matmul %0, %1, %cst {dimension_numbers = #tpu.dot_dimension_numbers<[1], [0], [0], [1], [0, 0, 1, 1], [], []>} : vector<128x147xbf16>, vector<147x64xbf16>, vector<128x64xf32> -> vector<128x64xf32>
    %c0_3 = arith.constant 0 : index
    %c0_4 = arith.constant 0 : index
    %3 = vector.load %arg3[%c0_3, %c0_4] : memref<1x64xf32, #tpu.memory_space<vmem>>, vector<1x64xf32>
    %4 = vector.broadcast %3 : vector<1x64xf32> to vector<128x64xf32>
    %5 = arith.addf %2, %4 : vector<128x64xf32>
    %cst_5 = arith.constant 0.000000e+00 : f32
    %6 = vector.broadcast %cst_5 : f32 to vector<128x64xf32>
    %7 = arith.maximumf %5, %6 : vector<128x64xf32>
    %8 = arith.truncf %7 : vector<128x64xf32> to vector<128x64xbf16>
    %c0_6 = arith.constant 0 : index
    %c0_7 = arith.constant 0 : index
    %9 = vector.load %arg4[%c0_6, %c0_7] : memref<128x64xbf16, #tpu.memory_space<vmem>>, vector<128x64xbf16>
    tpu.vector_store %arg4[%c0_6, %c0_7], %8 {strides = array<i32>} : memref<128x64xbf16, #tpu.memory_space<vmem>>, vector<128x64xbf16>,
    return
  }
  func.func @transform_0(%arg0: i32) -> (i32, i32) {
    %c0_i32 = arith.constant 0 : i32
    %c0_i32_0 = arith.constant 0 : i32
    return %arg0, %c0_i32 : i32, i32
  }
  func.func @transform_1(%arg0: i32) -> (i32, i32) {
    %c0_i32 = arith.constant 0 : i32
    %c0_i32_0 = arith.constant 0 : i32
    %c0_i32_1 = arith.constant 0 : i32
    return %c0_i32, %c0_i32_0 : i32, i32
  }
  func.func @transform_2(%arg0: i32) -> (i32, i32) {
    %c0_i32 = arith.constant 0 : i32
    %c0_i32_0 = arith.constant 0 : i32
    %c0_i32_1 = arith.constant 0 : i32
    return %c0_i32, %c0_i32_0 : i32, i32
  }
  func.func @transform_3(%arg0: i32) -> (i32, i32) {
    %c0_i32 = arith.constant 0 : i32
    %c0_i32_0 = arith.constant 0 : i32
    return %arg0, %c0_i32 : i32, i32
  }
}

</mosaic_0001>

<bundles_post_ra>
// kernel: tpu_custom_call.1
= control target key start
LH: loop header
LB: loop body
LE: loop exit
PB: predicated region body
PF: predicated region fallthrough
CT: control target
= control target key end

     0   :  { %s805_s12 = smov 0   ;;  %s937_s0 = inlined_call_operand.vmem [shape: bf16[512,147], index: 0, kind: input, shape index: {}]   ;;  %s938_s1 = inlined_call_operand.vmem [shape: bf16[147,64], index: 1, kind: input, shape index: {}]   ;;  %s939_s2 = inlined_call_operand.vmem [shape: f32[1,64], index: 2, kind: input, shape index: {}]   ;;  %s940_s3 = inlined_call_operand.vmem [shape: bf16[512,64], index: 3, kind: output, shape index: {}]  }
   0x1 LB: > { %s631_s13 = sadd.s32 4294967295, %s781_s12   ;;  %p635_p0 = scmp.ge.s32.totalorder %s781_s12, 1  ;;  %s781_s12 = sphi %s805_s12, %s13_s12  }
   0x2   : > { %p139_p1 = scmp.lt.s32.totalorder %s781_s12, 5 }
   0x4   : > { %p140_p2 = pnand %p635_p0, %p139_p1 }
   0x5   : > { %s636_s20 = sshll.u32 (!%p140_p2), %s631_s13, 4 }
   0x6   : > { %143 = sbr.rel (%p140_p2) target bundleno = 280 (0x118), region = 32  ;;  %p165_p3 = scmp.lt.s32.totalorder (!%p140_p2), %s636_s20, 63 }
   0xb   : > { %v741_v0 = vld [vmem:[%s938_s1 + $0x38] sm:$0xff]   ;;  %v783_v1 = vmov 0   ;;  %v742_v2 = vld [vmem:[%s938_s1 + $0x30] sm:$0xff]   ;;  %v743_v3 = vld [vmem:[%s938_s1 + $0x28] sm:$0xff]   ;;  %s942_s20 = smov (!%p165_p3, %s636_s20), 63  ;;  %vm349_vm0 = vcmask 154624  }
   0xc   : > { %381 = vmatprep.subr.bf16.mxu0 %v783_v1  ;;  %711 = vmatprep.subr.bf16.mxu1 %v783_v1  ;;  %v744_v4 = vld [vmem:[%s938_s1 + $0x20] sm:$0xff]   ;;  %s694_s23 = sshll.u32 %s942_s20, 3  ;;  %v745_v5 = vld [vmem:[%s938_s1 + $0x18] sm:$0xff]   ;;  %v746_v8 = vld [vmem:[%s938_s1 + $0x10] sm:$0xff]   ;;  %vm374_vm1 = vcmask 1040384   ;;  %vm375_vm2 = vcmask 1041408  }
   0xd   : > { %382 = vmatpush1.bf16.msra.mxu0 %v741_v0  ;;  %721 = vmatpush1.bf16.msra.mxu1 %v741_v0  ;;  %s831_s26 = scalar_lea.vmem %s937_s0, %s694_s23  ;;  %v747_v9 = vld [vmem:[%s938_s1 + $0x8] sm:$0xff]   ;;  %v784_v10 = vmov 65535   ;;  %v748_v12 = vld [vmem:[%s938_s1] sm:$0xff]   ;;  %s640_s15 = sshll.u32 %s942_s20, 2  ;;  %vm558_vm3 = vcmask 519168  }
   0xe   : > { %383 = vmatprep.subr.bf16.mxu0 %v783_v1  ;;  %712 = vmatprep.subr.bf16.mxu1 %v783_v1  ;;  %v753_v6 = vld [vmem:[%s831_s26 + $0x4] ss:$8 sps:$4 sm:$0xff]   ;;  %v376_v11 = vsel %vm374_vm1, 4294967295, %v784_v10  ;;  %v749_v13 = vld [vmem:[%s938_s1 + $0x48] ss:$0 sps:$4 sm:$0x33]   ;;  %s886_s18 = scalar_lea.vmem %s940_s3, %s640_s15 }
   0xf   : > { %v756_v7 = vld [vmem:[%s831_s26 + $0x44] ss:$8 sps:$4 sm:$0xff]   ;;  %668 = vmatprep.mubr.msk.bf16.mxu0 %vm349_vm0, %v753_v6  ;;  %v377_v14 = vsel %vm375_vm2, %v376_v11, 0  ;;  %v751_v17 = vld [vmem:[%s831_s26] ss:$8 sps:$4 sm:$0xff]  }
  0x10   : > { %672 = vmatprep.mubr.msk.bf16.mxu1 %vm349_vm0, %v756_v7  ;;  %v379_v15 = vand.u32 %v749_v13, %v377_v14  ;;  %v750_v16 = vld [vmem:[%s938_s1 + $0x40] sm:$0xff]   ;;  %v757_v19 = vld [vmem:[%s831_s26 + $0x14] ss:$8 sps:$4 sm:$0xff]   ;;  %v761_v21 = vld [vmem:[%s831_s26 + $0x10] ss:$8 sps:$4 sm:$0xff]  }
  0x11   : > { %384 = vmatpush1.bf16.msra.mxu0 %v742_v2  ;;  %722 = vmatpush1.bf16.msra.mxu1 %v742_v2  ;;  %v754_v18 = vld [vmem:[%s831_s26 + $0x40] ss:$8 sps:$4 sm:$0xff]   ;;  %v759_v20 = vld [vmem:[%s831_s26 + $0x54] ss:$8 sps:$4 sm:$0xff]   ;;  %v762_v22 = vld [vmem:[%s831_s26 + $0x50] ss:$8 sps:$4 sm:$0xff]  }
  0x12   : > { %385 = vmatprep.subr.bf16.mxu0 %v783_v1  ;;  %713 = vmatprep.subr.bf16.mxu1 %v783_v1  ;;  %v763_v23 = vld [vmem:[%s831_s26 + $0x24] ss:$8 sps:$4 sm:$0xff]   ;;  %v767_v25 = vld [vmem:[%s831_s26 + $0x20] ss:$8 sps:$4 sm:$0xff]   ;;  %v769_v27 = vld [vmem:[%s831_s26 + $0x34] ss:$8 sps:$4 sm:$0xff]  }
  0x13   : > { %v765_v24 = vld [vmem:[%s831_s26 + $0x64] ss:$8 sps:$4 sm:$0xff]   ;;  %v768_v26 = vld [vmem:[%s831_s26 + $0x60] ss:$8 sps:$4 sm:$0xff]   ;;  %v771_v28 = vld [vmem:[%s831_s26 + $0x74] ss:$8 sps:$4 sm:$0xff]  }
  0x14   : > { %v773_v29 = vld [vmem:[%s831_s26 + $0x30] ss:$8 sps:$4 sm:$0xff]   ;;  %v878_v31 = vld [vmem:[%s939_s2] ss:$0 sm:$0xff] }
  0x15   : > { %386 = vmatpush1.bf16.msra.mxu0 %v743_v3  ;;  %723 = vmatpush1.bf16.msra.mxu1 %v743_v3  ;;  %v774_v30 = vld [vmem:[%s831_s26 + $0x70] ss:$8 sps:$4 sm:$0xff]  }
  0x16   : > { %387 = vmatprep.subr.bf16.mxu0 %v783_v1  ;;  %714 = vmatprep.subr.bf16.mxu1 %v783_v1 }
  0x19   : > { %388 = vmatpush1.bf16.msra.mxu0 %v744_v4  ;;  %724 = vmatpush1.bf16.msra.mxu1 %v744_v4 }
  0x1a   : > { %389 = vmatprep.subr.bf16.mxu0 %v783_v1  ;;  %715 = vmatprep.subr.bf16.mxu1 %v783_v1 }
  0x1d   : > { %390 = vmatpush1.bf16.msra.mxu0 %v745_v5  ;;  %725 = vmatpush1.bf16.msra.mxu1 %v745_v5 }
  0x1e   : > { %391 = vmatprep.subr.bf16.mxu0 %v783_v1  ;;  %716 = vmatprep.subr.bf16.mxu1 %v783_v1 }
  0x21   : > { %392 = vmatpush1.bf16.msra.mxu0 %v746_v8  ;;  %726 = vmatpush1.bf16.msra.mxu1 %v746_v8 }
  0x22   : > { %393 = vmatprep.subr.bf16.mxu0 %v783_v1  ;;  %717 = vmatprep.subr.bf16.mxu1 %v783_v1 }
  0x25   : > { %394 = vmatpush1.bf16.msra.mxu0 %v747_v9  ;;  %727 = vmatpush1.bf16.msra.mxu1 %v747_v9 }
  0x26   : > { %395 = vmatprep.subr.bf16.mxu0 %v783_v1  ;;  %718 = vmatprep.subr.bf16.mxu1 %v783_v1 }
  0x29   : > { %396 = vmatpush1.bf16.msra.mxu0 %v748_v12  ;;  %728 = vmatpush1.bf16.msra.mxu1 %v748_v12 }
  0x2a   : > { %409 = vmatprep.subr.bf16.mxu0 %v783_v1  ;;  %719 = vmatprep.subr.bf16.mxu1 %v783_v1 }
  0x2d   : > { %410 = vmatpush2.bf16.msra.mxu0 %v379_v15  ;;  %729 = vmatpush2.bf16.msra.mxu1 %v379_v15 }
  0x2e   : > { %411 = vmatprep.subr.bf16.mxu0 %v783_v1  ;;  %720 = vmatprep.subr.bf16.mxu1 %v783_v1 }
  0x31   : > { %412 = vmatpush2.bf16.msra.mxu0 %v750_v16  ;;  %730 = vmatpush2.bf16.msra.mxu1 %v750_v16 }
  0x34   : > { %414 = vmatmul.mubr.bf16.vlgmr.msra.gmra.mxu0 %v751_v17  ;;  %446 = vmatmul.mubr.bf16.vlgmr.msra.gmra.mxu1 %v754_v18 }
  0x35   : > { %669 = vmatprep.mubr.msk.bf16.mxu0 %vm349_vm0, %v757_v19  ;;  %673 = vmatprep.mubr.msk.bf16.mxu1 %vm349_vm0, %v759_v20 }
  0x3c   : > { %422 = vmatmul.mubr.bf16.gmra.mxu0 %v761_v21  ;;  %454 = vmatmul.mubr.bf16.gmra.mxu1 %v762_v22 }
  0x3d   : > { %670 = vmatprep.mubr.msk.bf16.mxu0 %vm349_vm0, %v763_v23  ;;  %674 = vmatprep.mubr.msk.bf16.mxu1 %vm349_vm0, %v765_v24 }
  0x44   : > { %430 = vmatmul.mubr.bf16.gmra.mxu0 %v767_v25  ;;  %462 = vmatmul.mubr.bf16.gmra.mxu1 %v768_v26 }
  0x45   : > { %671 = vmatprep.mubr.msk.bf16.mxu0 %vm349_vm0, %v769_v27  ;;  %675 = vmatprep.mubr.msk.bf16.mxu1 %vm349_vm0, %v771_v28 }
  0x4c   : > { %438 = vmatmul.mubr.bf16.gmra.mxu0 %v773_v29  ;;  %470 = vmatmul.mubr.bf16.gmra.mxu1 %v774_v30 }
  0xf4   : > { %v415_v32 = vpop.f32.mrf.mxu0  ;;  %v447_v33 = vpop.f32.mrf.mxu1 }
  0xf5   : > { %v416_v34 = vadd.f32 %v878_v31, %v415_v32  ;;  %v448_v35 = vadd.f32 %v878_v31, %v447_v33 }
  0xf6   : > { %v417_v36 = vpop.f32.mrf.mxu0  ;;  %v449_v37 = vpop.f32.mrf.mxu1 }
  0xf7   : > { %v478_v38 = vmax.f32 %v416_v34, 0.0  ;;  %v486_v39 = vmax.f32 %v448_v35, 0.0 }
  0xf8   : > { %v418_v40 = vpop.f32.mrf.mxu0  ;;  %v450_v41 = vpop.f32.mrf.mxu1 }
  0xf9   : > { %v695_v42 = vpack.c.bf16 %v478_v38, %v478_v38  ;;  %v703_v43 = vpack.c.bf16 %v486_v39, %v486_v39  ;;  %v419_v44 = vadd.f32 %v878_v31, %v418_v40  ;;  %v451_v45 = vadd.f32 %v878_v31, %v450_v41 }
  0xfa   : > { %v420_v46 = vpop.f32.mrf.mxu0  ;;  %v452_v47 = vpop.f32.mrf.mxu1 }
  0xfb   : > { %559 = vst.msk [vmem:[%s886_s18] sm:$0xf] %vm558_vm3, %v695_v42  ;;  %567 = vst.msk [vmem:[%s886_s18 + $0x20] sm:$0xf] %vm558_vm3, %v703_v43  ;;  %v479_v48 = vmax.f32 %v419_v44, 0.0  ;;  %v487_v49 = vmax.f32 %v451_v45, 0.0 }
  0xfc   : > { %v423_v50 = vpop.f32.mrf.mxu0  ;;  %v455_v51 = vpop.f32.mrf.mxu1 }
  0xfd   : > { %v696_v52 = vpack.c.bf16 %v479_v48, %v479_v48  ;;  %v704_v53 = vpack.c.bf16 %v487_v49, %v487_v49  ;;  %v424_v54 = vadd.f32 %v878_v31, %v423_v50  ;;  %v456_v55 = vadd.f32 %v878_v31, %v455_v51 }
  0xfe   : > { %v425_v56 = vpop.f32.mrf.mxu0  ;;  %v457_v57 = vpop.f32.mrf.mxu1 }
  0xff   : > { %560 = vst.msk [vmem:[%s886_s18 + $0x4] sm:$0xf] %vm558_vm3, %v696_v52  ;;  %568 = vst.msk [vmem:[%s886_s18 + $0x24] sm:$0xf] %vm558_vm3, %v704_v53  ;;  %v480_v58 = vmax.f32 %v424_v54, 0.0  ;;  %v488_v59 = vmax.f32 %v456_v55, 0.0 }
 0x100   : > { %v426_v60 = vpop.f32.mrf.mxu0  ;;  %v458_v61 = vpop.f32.mrf.mxu1 }
 0x101   : > { %v697_v62 = vpack.c.bf16 %v480_v58, %v480_v58  ;;  %v705_v63 = vpack.c.bf16 %v488_v59, %v488_v59  ;;  %v427_v0 = vadd.f32 %v878_v31, %v426_v60  ;;  %v459_v1 = vadd.f32 %v878_v31, %v458_v61 }
 0x102   : > { %v428_v2 = vpop.f32.mrf.mxu0  ;;  %v460_v3 = vpop.f32.mrf.mxu1 }
 0x103   : > { %561 = vst.msk [vmem:[%s886_s18 + $0x8] sm:$0xf] %vm558_vm3, %v697_v62  ;;  %569 = vst.msk [vmem:[%s886_s18 + $0x28] sm:$0xf] %vm558_vm3, %v705_v63  ;;  %v481_v4 = vmax.f32 %v427_v0, 0.0  ;;  %v489_v5 = vmax.f32 %v459_v1, 0.0 }
 0x104   : > { %v431_v6 = vpop.f32.mrf.mxu0  ;;  %v463_v7 = vpop.f32.mrf.mxu1 }
 0x105   : > { %v698_v8 = vpack.c.bf16 %v481_v4, %v481_v4  ;;  %v706_v9 = vpack.c.bf16 %v489_v5, %v489_v5  ;;  %v432_v10 = vadd.f32 %v878_v31, %v431_v6  ;;  %v464_v11 = vadd.f32 %v878_v31, %v463_v7 }
 0x106   : > { %v433_v12 = vpop.f32.mrf.mxu0  ;;  %v465_v13 = vpop.f32.mrf.mxu1 }
 0x107   : > { %562 = vst.msk [vmem:[%s886_s18 + $0xc] sm:$0xf] %vm558_vm3, %v698_v8  ;;  %570 = vst.msk [vmem:[%s886_s18 + $0x2c] sm:$0xf] %vm558_vm3, %v706_v9  ;;  %v482_v14 = vmax.f32 %v432_v10, 0.0  ;;  %v490_v15 = vmax.f32 %v464_v11, 0.0 }
 0x108   : > { %v434_v16 = vpop.f32.mrf.mxu0  ;;  %v466_v17 = vpop.f32.mrf.mxu1 }
 0x109   : > { %v699_v18 = vpack.c.bf16 %v482_v14, %v482_v14  ;;  %v707_v19 = vpack.c.bf16 %v490_v15, %v490_v15  ;;  %v435_v20 = vadd.f32 %v878_v31, %v434_v16  ;;  %v467_v21 = vadd.f32 %v878_v31, %v466_v17 }
 0x10a   : > { %v436_v22 = vpop.f32.mrf.mxu0  ;;  %v468_v23 = vpop.f32.mrf.mxu1 }
 0x10b   : > { %563 = vst.msk [vmem:[%s886_s18 + $0x10] sm:$0xf] %vm558_vm3, %v699_v18  ;;  %571 = vst.msk [vmem:[%s886_s18 + $0x30] sm:$0xf] %vm558_vm3, %v707_v19  ;;  %v483_v24 = vmax.f32 %v435_v20, 0.0  ;;  %v491_v25 = vmax.f32 %v467_v21, 0.0 }
 0x10c   : > { %v439_v26 = vpop.f32.mrf.mxu0  ;;  %v471_v27 = vpop.f32.mrf.mxu1 }
 0x10d   : > { %v700_v28 = vpack.c.bf16 %v483_v24, %v483_v24  ;;  %v708_v29 = vpack.c.bf16 %v491_v25, %v491_v25  ;;  %v440_v30 = vadd.f32 %v878_v31, %v439_v26  ;;  %v472_v32 = vadd.f32 %v878_v31, %v471_v27 }
 0x10e   : > { %v441_v33 = vpop.f32.mrf.mxu0  ;;  %v473_v34 = vpop.f32.mrf.mxu1 }
 0x10f   : > { %564 = vst.msk [vmem:[%s886_s18 + $0x14] sm:$0xf] %vm558_vm3, %v700_v28  ;;  %572 = vst.msk [vmem:[%s886_s18 + $0x34] sm:$0xf] %vm558_vm3, %v708_v29  ;;  %v484_v35 = vmax.f32 %v440_v30, 0.0  ;;  %v492_v36 = vmax.f32 %v472_v32, 0.0 }
 0x110   : > { %v442_v37 = vpop.f32.mrf.mxu0  ;;  %v474_v38 = vpop.f32.mrf.mxu1 }
 0x111   : > { %v701_v39 = vpack.c.bf16 %v484_v35, %v484_v35  ;;  %v709_v40 = vpack.c.bf16 %v492_v36, %v492_v36  ;;  %v443_v41 = vadd.f32 %v878_v31, %v442_v37  ;;  %v475_v42 = vadd.f32 %v878_v31, %v474_v38 }
 0x112   : > { %v444_v43 = vpop.f32.mrf.mxu0  ;;  %v476_v44 = vpop.f32.mrf.mxu1 }
 0x113   : > { %565 = vst.msk [vmem:[%s886_s18 + $0x18] sm:$0xf] %vm558_vm3, %v701_v39  ;;  %573 = vst.msk [vmem:[%s886_s18 + $0x38] sm:$0xf] %vm558_vm3, %v709_v40  ;;  %v485_v45 = vmax.f32 %v443_v41, 0.0  ;;  %v493_v46 = vmax.f32 %v475_v42, 0.0 }
 0x115   : > { %v702_v47 = vpack.c.bf16 %v485_v45, %v485_v45  ;;  %v710_v48 = vpack.c.bf16 %v493_v46, %v493_v46 }
 0x117   : > { %566 = vst.msk [vmem:[%s886_s18 + $0x1c] sm:$0xf] %vm558_vm3, %v702_v47  ;;  %574 = vst.msk [vmem:[%s886_s18 + $0x3c] sm:$0xf] %vm558_vm3, %v710_v48 }
 0x118 PF: > { %s13_s12 = sadd.s32 1, %s781_s12  }
 0x119   : > { %p10_p4 = scmp.ge.s32.totalorder %s13_s12, 6  }
 0x11b   :  { %12 = sbr.rel (!%p10_p4) target bundleno = 1 (0x1), region = 62 }

</bundles_post_ra>
